<compile_context>
chip_gen: v7x
topology: tpu7x:2x2x1
jax: 0.10.0
libtpu: 0.0.40
codegen_flags: <defaults>
</compile_context>

<pallas_src>
import jax
import jax.numpy as jnp
from jax.experimental import pallas as pl
from jax.experimental.pallas import tpu as pltpu


# ------------------------------------------------------------------ helpers --

def make_divisible(in_channel, divisor=8, min_ch=None):
    if min_ch is None:
        min_ch = divisor
    new_ch = max(min_ch, (in_channel + divisor / 2) // divisor * divisor)
    if new_ch < 0.9 * in_channel:
        new_ch += divisor
    return int(new_ch)


# ------------------------------------------------------------------- kernel --

def _se_fused_kernel(x_ref, w1t_ref, b1_ref, w2t_ref, b2_ref, o_ref):
    """Fused SE block for a tile of B_TILE batch elements.

    x_ref  : [Bt, C, HW]  feature slab, activation dtype (e.g. bf16)
    w1t_ref: [C, Csq]     fc1 weight, transposed, f32 (VMEM resident)
    b1_ref : [1, Csq]     fc1 bias, f32
    w2t_ref: [Csq, C]     fc2 weight, transposed, f32 (VMEM resident)
    b2_ref : [1, C]       fc2 bias, f32
    o_ref  : [Bt, C, HW]  gated output, activation dtype
    """
    x = x_ref[...]                                   # [Bt, C, HW], native dtype
    hw = x.shape[-1]

    # Global average pool: XLU lane-reduce, accumulated in f32; 1/HW scale kept in f32.
    pooled = jnp.sum(x.astype(jnp.float32), axis=-1) * (1.0 / hw)      # [Bt, C] f32

    # fc1 (1x1 conv) + ReLU  -- tiny batched matmul on VMEM-resident weights.
    h = jnp.dot(pooled, w1t_ref[...], preferred_element_type=jnp.float32) + b1_ref[...]
    h = jnp.maximum(h, 0.0)                                            # [Bt, Csq]

    # fc2 (1x1 conv) + Hardsigmoid (relu6(x+3)/6 == clip(x/6 + 1/2, 0, 1)).
    g = jnp.dot(h, w2t_ref[...], preferred_element_type=jnp.float32) + b2_ref[...]
    g = jnp.clip(g * (1.0 / 6.0) + 0.5, 0.0, 1.0)                      # [Bt, C] f32

    # Cast the gate back to the activation dtype so the big multiply stays bf16.
    g = g.astype(x.dtype)
    o_ref[...] = x * g[:, :, None]                   # per-channel scalar over HW lanes


# ------------------------------------------------------------------ wrapper --

def _pick_batch_tile(n, per_image_bytes, target_block_bytes=1 << 20):
    """Largest batch tile that (a) keeps a block near ~1 MiB, (b) divides N,
    and (c) leaves >= 2 grid steps when possible (megacore on v7x)."""
    bt = max(1, min(n, target_block_bytes // max(per_image_bytes, 1)))
    if n >= 2:
        bt = min(bt, max(1, n // 2))
    while n % bt:
        bt -= 1
    return bt


def se_block_forward(x_nchw, w1, b1, w2, b2):
    """SEBlock.forward: x * hardsigmoid(fc2(relu(fc1(avgpool(x))))).

    x_nchw: [N, C, H, W]  (PyTorch layout, any float dtype — kept as-is)
    w1:     [Csq, C] (or [Csq, C, 1, 1]),  b1: [Csq]
    w2:     [C, Csq] (or [C, Csq, 1, 1]),  b2: [C]
    """
    N, C, H, W = x_nchw.shape
    HW = H * W
    act_dtype = x_nchw.dtype

    # Params in f32, pre-transposed for row-vector (batched) math inside the kernel.
    w1 = jnp.asarray(w1, jnp.float32).reshape(w1.shape[0], -1)          # [Csq, C]
    w2 = jnp.asarray(w2, jnp.float32).reshape(w2.shape[0], -1)          # [C, Csq]
    Csq = w1.shape[0]
    w1t = w1.T                                                          # [C, Csq]
    w2t = w2.T                                                          # [Csq, C]
    b1 = jnp.asarray(b1, jnp.float32).reshape(1, Csq)
    b2 = jnp.asarray(b2, jnp.float32).reshape(1, C)

    # Free reshape (no transpose, no dtype change): [N, C, H*W].
    x = x_nchw.reshape(N, C, HW)

    per_image_bytes = C * HW * jnp.dtype(act_dtype).itemsize
    bt = _pick_batch_tile(N, per_image_bytes)
    grid = (N // bt,)

    out = pl.pallas_call(
        _se_fused_kernel,
        out_shape=jax.ShapeDtypeStruct((N, C, HW), act_dtype),
        grid_spec=pltpu.PrefetchScalarGridSpec(
            num_scalar_prefetch=0,
            grid=grid,
            in_specs=[
                # Feature slab: B_TILE images per step (last two dims = full array dims).
                pl.BlockSpec((bt, C, HW), lambda n: (n, 0, 0)),
                # Weights/biases: constant block index -> DMA'd once, VMEM-resident.
                pl.BlockSpec((C, Csq), lambda n: (0, 0)),
                pl.BlockSpec((1, Csq), lambda n: (0, 0)),
                pl.BlockSpec((Csq, C), lambda n: (0, 0)),
                pl.BlockSpec((1, C), lambda n: (0, 0)),
            ],
            out_specs=pl.BlockSpec((bt, C, HW), lambda n: (n, 0, 0)),
        ),
        compiler_params=pltpu.CompilerParams(
            dimension_semantics=("parallel",),      # shard batch tiles across TCs (v7x)
            vmem_limit_bytes=32 * 1024 * 1024,      # raise v5e's 16 MiB default; safe on v7x
        ),
    )(x, w1t, b1, w2t, b2)

    return out.reshape(N, C, H, W)


# ---------------------------------------------------------------- reference --

def se_block_reference(x, w1, b1, w2, b2):
    """Pure-JAX f32 reference matching the PyTorch SEBlock semantics."""
    xf = x.astype(jnp.float32)
    pooled = jnp.mean(xf, axis=(2, 3))                                  # [N, C]
    h = jnp.maximum(pooled @ w1.T + b1, 0.0)                            # [N, Csq]
    g = jnp.clip((h @ w2.T + b2) * (1.0 / 6.0) + 0.5, 0.0, 1.0)         # [N, C]
    return xf * g[:, :, None, None]


# --------------------------------------------------------------------- main --

if __name__ == "__main__":
    # First SE block in MobileNetV3-small: in_channel=16 -> squeeze=8. HW = 16*16 = 256
    # (lane-dense). batch=8 so batch-tiling yields a 2-step parallel grid.
    N, C, H, W = 8, 16, 16, 16
    Csq = make_divisible(C / 4)                     # -> 8

    key = jax.random.PRNGKey(0)
    kx, k1, k2, k3, k4 = jax.random.split(key, 5)
    x = jax.random.normal(kx, (N, C, H, W), jnp.float32).astype(jnp.bfloat16)
    w1 = jax.random.normal(k1, (Csq, C), jnp.float32) * 0.1
    b1 = jax.random.normal(k2, (Csq,), jnp.float32) * 0.05
    w2 = jax.random.normal(k3, (C, Csq), jnp.float32) * 0.1
    b2 = jax.random.normal(k4, (C,), jnp.float32) * 0.05

    fwd = jax.jit(se_block_forward)
    out = fwd(x, w1, b1, w2, b2)
    jax.block_until_ready(out)

    ref = se_block_reference(x, w1, b1, w2, b2)
    assert out.shape == (N, C, H, W) and out.dtype == x.dtype
    # bf16 activations + bf16 output rounding -> relaxed tolerance vs. f32 reference.
    max_err = float(jnp.max(jnp.abs(out.astype(jnp.float32) - ref)))
    assert max_err < 3e-2, f"mismatch vs reference: {max_err}"

    print("KERNEL_OK")
</pallas_src>

<mosaic_0001>
module attributes {stable_mosaic.version = 11 : i64} {
  func.func @_se_fused_kernel(%arg0: i32, %arg1: memref<4x16x256xbf16, #tpu.memory_space<vmem>>, %arg2: memref<16x8xf32, #tpu.memory_space<vmem>>, %arg3: memref<1x8xf32, #tpu.memory_space<vmem>>, %arg4: memref<8x16xf32, #tpu.memory_space<vmem>>, %arg5: memref<1x16xf32, #tpu.memory_space<vmem>>, %arg6: memref<4x16x256xbf16, #tpu.memory_space<vmem>>) attributes {dimension_semantics = [#tpu.dimension_semantics<parallel>], iteration_bounds = array<i64: 2>, scalar_prefetch = 0 : i64, scratch_operands = 0 : i64, tpu.core_type = #tpu.core_type<tc>, window_params = [{transform_indices = @transform_0, window_bounds = array<i64: 4, 16, 256>}, {pipeline_mode = #tpu.pipeline_mode<synchronous>, transform_indices = @transform_1, window_bounds = array<i64: 16, 8>}, {pipeline_mode = #tpu.pipeline_mode<synchronous>, transform_indices = @transform_2, window_bounds = array<i64: 1, 8>}, {pipeline_mode = #tpu.pipeline_mode<synchronous>, transform_indices = @transform_3, window_bounds = array<i64: 8, 16>}, {pipeline_mode = #tpu.pipeline_mode<synchronous>, transform_indices = @transform_4, window_bounds = array<i64: 1, 16>}, {transform_indices = @transform_5, window_bounds = array<i64: 4, 16, 256>}]} {
    %c0 = arith.constant 0 : index
    %c0_0 = arith.constant 0 : index
    %c0_1 = arith.constant 0 : index
    %0 = vector.load %arg1[%c0, %c0_0, %c0_1] : memref<4x16x256xbf16, #tpu.memory_space<vmem>>, vector<4x16x256xbf16>
    %1 = arith.extf %0 : vector<4x16x256xbf16> to vector<4x16x256xf32>
    %cst = arith.constant dense<0.000000e+00> : vector<4x16xf32>
    %2 = vector.multi_reduction <add>, %1, %cst [2] : vector<4x16x256xf32> to vector<4x16xf32>
    %cst_2 = arith.constant 3.906250e-03 : f32
    %3 = vector.broadcast %cst_2 : f32 to vector<4x16xf32>
    %4 = arith.mulf %2, %3 : vector<4x16xf32>
    %c0_3 = arith.constant 0 : index
    %c0_4 = arith.constant 0 : index
    %5 = vector.load %arg2[%c0_3, %c0_4] : memref<16x8xf32, #tpu.memory_space<vmem>>, vector<16x8xf32>
    %cst_5 = arith.constant dense<0.000000e+00> : vector<4x8xf32>
    %6 = tpu.matmul %4, %5, %cst_5 {dimension_numbers = #tpu.dot_dimension_numbers<[1], [0], [0], [1], [0, 0, 1, 1], [], []>} : vector<4x16xf32>, vector<16x8xf32>, vector<4x8xf32> -> vector<4x8xf32>
    %c0_6 = arith.constant 0 : index
    %c0_7 = arith.constant 0 : index
    %7 = vector.load %arg3[%c0_6, %c0_7] : memref<1x8xf32, #tpu.memory_space<vmem>>, vector<1x8xf32>
    %8 = vector.broadcast %7 : vector<1x8xf32> to vector<4x8xf32>
    %9 = arith.addf %6, %8 : vector<4x8xf32>
    %cst_8 = arith.constant 0.000000e+00 : f32
    %10 = vector.broadcast %cst_8 : f32 to vector<4x8xf32>
    %11 = arith.maximumf %9, %10 : vector<4x8xf32>
    %c0_9 = arith.constant 0 : index
    %c0_10 = arith.constant 0 : index
    %12 = vector.load %arg4[%c0_9, %c0_10] : memref<8x16xf32, #tpu.memory_space<vmem>>, vector<8x16xf32>
    %cst_11 = arith.constant dense<0.000000e+00> : vector<4x16xf32>
    %13 = tpu.matmul %11, %12, %cst_11 {dimension_numbers = #tpu.dot_dimension_numbers<[1], [0], [0], [1], [0, 0, 1, 1], [], []>} : vector<4x8xf32>, vector<8x16xf32>, vector<4x16xf32> -> vector<4x16xf32>
    %c0_12 = arith.constant 0 : index
    %c0_13 = arith.constant 0 : index
    %14 = vector.load %arg5[%c0_12, %c0_13] : memref<1x16xf32, #tpu.memory_space<vmem>>, vector<1x16xf32>
    %15 = vector.broadcast %14 : vector<1x16xf32> to vector<4x16xf32>
    %16 = arith.addf %13, %15 : vector<4x16xf32>
    %cst_14 = arith.constant 0.166666672 : f32
    %17 = vector.broadcast %cst_14 : f32 to vector<4x16xf32>
    %18 = arith.mulf %16, %17 : vector<4x16xf32>
    %cst_15 = arith.constant 5.000000e-01 : f32
    %19 = vector.broadcast %cst_15 : f32 to vector<4x16xf32>
    %20 = arith.addf %18, %19 : vector<4x16xf32>
    %cst_16 = arith.constant 0.000000e+00 : f32
    %cst_17 = arith.constant 1.000000e+00 : f32
    %21 = vector.broadcast %cst_16 : f32 to vector<4x16xf32>
    %22 = arith.maximumf %21, %20 : vector<4x16xf32>
    %23 = vector.broadcast %cst_17 : f32 to vector<4x16xf32>
    %24 = arith.minimumf %23, %22 : vector<4x16xf32>
    %25 = arith.truncf %24 : vector<4x16xf32> to vector<4x16xbf16>
    %26 = vector.shape_cast %25 : vector<4x16xbf16> to vector<4x16x1xbf16>
    %27 = vector.broadcast %26 : vector<4x16x1xbf16> to vector<4x16x256xbf16>
    %28 = arith.mulf %0, %27 : vector<4x16x256xbf16>
    %c0_18 = arith.constant 0 : index
    %c0_19 = arith.constant 0 : index
    %c0_20 = arith.constant 0 : index
    %29 = vector.load %arg6[%c0_18, %c0_19, %c0_20] : memref<4x16x256xbf16, #tpu.memory_space<vmem>>, vector<4x16x256xbf16>
    tpu.vector_store %arg6[%c0_18, %c0_19, %c0_20], %28 {strides = array<i32>} : memref<4x16x256xbf16, #tpu.memory_space<vmem>>, vector<4x16x256xbf16>,
    return
  }
  func.func @transform_0(%arg0: i32) -> (i32, i32, i32) {
    %c0_i32 = arith.constant 0 : i32
    %c0_i32_0 = arith.constant 0 : i32
    %c0_i32_1 = arith.constant 0 : i32
    return %arg0, %c0_i32, %c0_i32_0 : i32, i32, i32
  }
  func.func @transform_1(%arg0: i32) -> (i32, i32) {
    %c0_i32 = arith.constant 0 : i32
    %c0_i32_0 = arith.constant 0 : i32
    %c0_i32_1 = arith.constant 0 : i32
    return %c0_i32, %c0_i32_0 : i32, i32
  }
  func.func @transform_2(%arg0: i32) -> (i32, i32) {
    %c0_i32 = arith.constant 0 : i32
    %c0_i32_0 = arith.constant 0 : i32
    %c0_i32_1 = arith.constant 0 : i32
    return %c0_i32, %c0_i32_0 : i32, i32
  }
  func.func @transform_3(%arg0: i32) -> (i32, i32) {
    %c0_i32 = arith.constant 0 : i32
    %c0_i32_0 = arith.constant 0 : i32
    %c0_i32_1 = arith.constant 0 : i32
    return %c0_i32, %c0_i32_0 : i32, i32
  }
  func.func @transform_4(%arg0: i32) -> (i32, i32) {
    %c0_i32 = arith.constant 0 : i32
    %c0_i32_0 = arith.constant 0 : i32
    %c0_i32_1 = arith.constant 0 : i32
    return %c0_i32, %c0_i32_0 : i32, i32
  }
  func.func @transform_5(%arg0: i32) -> (i32, i32, i32) {
    %c0_i32 = arith.constant 0 : i32
    %c0_i32_0 = arith.constant 0 : i32
    %c0_i32_1 = arith.constant 0 : i32
    return %arg0, %c0_i32, %c0_i32_0 : i32, i32, i32
  }
}

</mosaic_0001>

<bundles_post_ra>
// kernel: se_block_forward.1
= control target key start
LH: loop header
LB: loop body
LE: loop exit
PB: predicated region body
PF: predicated region fallthrough
CT: control target
= control target key end

     0   :  { %s784_s18 = smov 0   ;;  %s875_s0 = inlined_call_operand.vmem [shape: bf16[8,16,256], index: 0, kind: input, shape index: {}]   ;;  %s876_s1 = inlined_call_operand.vmem [shape: f32[16,8], index: 1, kind: input, shape index: {}]   ;;  %s877_s2 = inlined_call_operand.vmem [shape: f32[1,8], index: 2, kind: input, shape index: {}]   ;;  %s878_s3 = inlined_call_operand.vmem [shape: f32[8,16], index: 3, kind: input, shape index: {}]   ;;  %s879_s4 = inlined_call_operand.vmem [shape: f32[1,16], index: 4, kind: input, shape index: {}]   ;;  %s880_s5 = inlined_call_operand.vmem [shape: bf16[8,16,256], index: 5, kind: output, shape index: {}]  }
   0x1 LB: > { %s689_s19 = sadd.s32 4294967295, %s747_s18   ;;  %p693_p0 = scmp.ge.s32.totalorder %s747_s18, 1  ;;  %s747_s18 = sphi %s784_s18, %s15_s18  }
   0x2   : > { %p189_p1 = scmp.lt.s32.totalorder %s747_s18, 3 }
   0x4   : > { %p190_p2 = pnand %p693_p0, %p189_p1 }
   0x5   : > { %s694_s20 = sshll.u32 (!%p190_p2), %s689_s19, 2  ;;  %v289_v32 = vld [vmem:[%s876_s1] sm:$0xff] (!%p190_p2)  ;;  %v290_v33 = vld [vmem:[%s876_s1 + $0x8] sm:$0xff] (!%p190_p2)  ;;  %v749_v35 = vmov (!%p190_p2), 0.0|0.0   ;;  %vm750_vm0 = vmmov (!%p190_p2), 0   ;;  %v751_v36 = vmov (!%p190_p2), 0.0   ;;  %v306_v37 = vlaneseq (!%p190_p2) }
   0x6   : > { %193 = sbr.rel (%p190_p2) target bundleno = 753 (0x2f1), region = 40  ;;  %p220_p3 = scmp.lt.s32.totalorder (!%p190_p2), %s694_s20, 7  ;;  %v726_v34 = vpack.c.bf16 (!%p190_p2), %v290_v33, %v289_v32  ;;  %725 = vmatprep.subr.bf16.mxu0 (!%p190_p2), %v749_v35  ;;  %717 = vmatprep.mubr.msk.f32.mxu0 (!%p190_p2), %vm750_vm0, %v751_v36  ;;  %vm317_vm1 = vcmask (!%p190_p2), 130112   ;;  %vm346_vm2 = vcmask (!%p190_p2), 1041409   ;;  %vm348_vm3 = vcmask (!%p190_p2), 1042434  }
   0x7   : > { %720 = vmatprep.subr.mxu1 (!%p190_p2), %v751_v36  ;;  %722 = vmatprep.mubr.msk.f32.mxu1 (!%p190_p2), %vm750_vm0, %v751_v36  ;;  %v307_v38 = vand.u32 (!%p190_p2), 127, %v306_v37  ;;  %v838_v42 = vshrl.u32 (!%p190_p2), %v306_v37, 7  ;;  %vm350_vm4 = vcmask (!%p190_p2), 1043459   ;;  %vm352_vm5 = vcmask (!%p190_p2), 130048  }
   0x8   : > { %727 = vmatpush3.bf16.msra.mxu0 (!%p190_p2), %v726_v34  ;;  %vm434_vm6 = vcmask (!%p190_p2), 64512  }
   0x9   : > { %v312_v41 = vadd.s32 (!%p190_p2), 4294967288, %v307_v38  ;;  %v310_v48 = vsub.s32 (!%p190_p2), %v307_v38, %v838_v42  ;;  %v535_v33 = vsub.s32 (!%p190_p2), 1, %v838_v42  ;;  %v518_v34 = vsub.s32 (!%p190_p2), 0, %v838_v42 }
   0xb   : > { %v315_v45 = vsub.s32 (!%p190_p2), %v312_v41, %v838_v42 }
   0xd   : > { %s882_s20 = smov (!%p220_p3, %s694_s20), 7 }
   0xe   : > { %s706_s21 = sshll.u32 %s882_s20, 4 }
   0xf   : > { %s224_s24 = scalar_lea.vmem %s875_s0, %s706_s21  ;;  %s231_s12 = scalar_lea.vmem %s880_s5, %s706_s21 }
  0x10   : > { %v800_v0 = vld [vmem:[%s224_s24 + $0x10] sm:$0xff]  ;;  %v802_v1 = vld [vmem:[%s224_s24] sm:$0xff]  ;;  %v804_v2 = vld [vmem:[%s224_s24 + $0x18] sm:$0xff] }
  0x11   : > { %v245_v3 = vunpack.c.l.bf16 %v800_v0  ;;  %v246_v4 = vunpack.c.h.bf16 %v800_v0  ;;  %v241_v5 = vunpack.c.l.bf16 %v802_v1  ;;  %v242_v6 = vunpack.c.h.bf16 %v802_v1  ;;  %v810_v7 = vld [vmem:[%s224_s24 + $0x8] sm:$0xff]  ;;  %v818_v13 = vld [vmem:[%s224_s24 + $0x20] sm:$0xff]  ;;  %v824_v22 = vld [vmem:[%s224_s24 + $0x38] sm:$0xff] }
  0x12   : > { %v812_v8 = vld [vmem:[%s224_s24 + $0x28] sm:$0xff]  ;;  %v247_v9 = vunpack.c.l.bf16 %v804_v2  ;;  %v248_v10 = vunpack.c.h.bf16 %v804_v2  ;;  %v243_v11 = vunpack.c.l.bf16 %v810_v7  ;;  %v244_v12 = vunpack.c.h.bf16 %v810_v7  ;;  %v826_v23 = vld [vmem:[%s224_s24 + $0x30] sm:$0xff] }
  0x13   : > { %v263_v14 = vadd.f32 %v246_v4, %v245_v3  ;;  %v257_v15 = vadd.f32 %v242_v6, %v241_v5  ;;  %v251_v16 = vunpack.c.l.bf16 %v812_v8  ;;  %v252_v17 = vunpack.c.h.bf16 %v812_v8 }
  0x14   : > { %v266_v18 = vadd.f32 %v248_v10, %v247_v9  ;;  %v260_v19 = vadd.f32 %v244_v12, %v243_v11  ;;  %v249_v20 = vunpack.c.l.bf16 %v818_v13  ;;  %v250_v21 = vunpack.c.h.bf16 %v818_v13 }
  0x15   : > { %264 = vadd.xlane.f32.xlu1 %v263_v14  ;;  %258 = vadd.xlane.f32.xlu0 %v257_v15  ;;  %v272_v24 = vadd.f32 %v252_v17, %v251_v16  ;;  %v255_v25 = vunpack.c.l.bf16 %v824_v22  ;;  %v256_v27 = vunpack.c.h.bf16 %v824_v22  ;;  %v253_v28 = vunpack.c.l.bf16 %v826_v23  ;;  %v426_v16 = vld [vmem:[%s878_s3] sm:$0xff] }
  0x16   : > { %v269_v26 = vadd.f32 %v250_v21, %v249_v20  ;;  %v254_v29 = vunpack.c.h.bf16 %v826_v23  ;;  %721 = vmatpush3.msra.mxu1 %v426_v16  ;;  %v700_v17 = vld [vmem:[%s877_s2] ss:$0 sm:$0xff] }
  0x17   : > { %v278_v30 = vadd.f32 %v256_v27, %v255_v25 }
  0x18   : > { %v275_v31 = vadd.f32 %v254_v29, %v253_v28 }
  0x19   : > { %267 = vadd.xlane.f32.xlu1 %v266_v18  ;;  %261 = vadd.xlane.f32.xlu0 %v260_v19 }
  0x1d   : > { %273 = vadd.xlane.f32.xlu1 %v272_v24  ;;  %270 = vadd.xlane.f32.xlu0 %v269_v26  ;;  %v702_v24 = vld [vmem:[%s879_s4] ss:$0 sm:$0xff] }
  0x21   : > { %279 = vadd.xlane.f32.xlu1 %v278_v30  ;;  %276 = vadd.xlane.f32.xlu0 %v275_v31 }
  0xa2   : > { %v265_v39 = vpop.xlane.xlu1 %264  ;;  %v259_v40 = vpop.xlane.xlu0 %258 }
  0xa3   : > { %v283_v49 = vmul.f32 0.00390625, %v265_v39  ;;  %v281_v50 = vmul.f32 0.00390625, %v259_v40 }
  0xa5   : > { %v322_v57 = vrot.slane %v283_v49, %v310_v48  ;;  %v311_v58 = vrot.slane %v281_v50, %v310_v48 }
  0xa6   : > { %v268_v43 = vpop.xlane.xlu1 %267  ;;  %v262_v44 = vpop.xlane.xlu0 %261 }
  0xa7   : > { %v284_v46 = vmul.f32 0.00390625, %v268_v43  ;;  %v282_v47 = vmul.f32 0.00390625, %v262_v44  ;;  %v752_v43 = vmov 839922192  }
  0xa8   : > { %v552_v44 = vunpack.c.l.s4 %v752_v43 }
  0xa9   : > { %v326_v53 = vrot.slane %v284_v46, %v315_v45  ;;  %v316_v54 = vrot.slane %v282_v47, %v315_v45 }
  0xaa   : > { %v274_v51 = vpop.xlane.xlu1 %273  ;;  %v271_v52 = vpop.xlane.xlu0 %270  ;;  %v553_v47 = vunpack.c.0.s8 %v552_v44 }
  0xab   : > { %v286_v55 = vmul.f32 0.00390625, %v274_v51  ;;  %v285_v56 = vmul.f32 0.00390625, %v271_v52  ;;  %v327_v63 = vsel %vm317_vm1, %v326_v53, %v322_v57  ;;  %v318_v3 = vsel %vm317_vm1, %v316_v54, %v311_v58 }
  0xac   : > { %v347_v11 = vsel %vm346_vm2, %v327_v63, %v318_v3  ;;  %v556_v49 = vsub.s32 %v553_v47, %v838_v42 }
  0xad   : > { %v335_v59 = vrot.slane %v286_v55, %v315_v45  ;;  %v331_v60 = vrot.slane %v285_v56, %v310_v48 }
  0xae   : > { %v280_v61 = vpop.xlane.xlu1 %279  ;;  %v277_v62 = vpop.xlane.xlu0 %276 }
  0xaf   : > { %v288_v4 = vmul.f32 0.00390625, %v280_v61  ;;  %v287_v5 = vmul.f32 0.00390625, %v277_v62  ;;  %v336_v6 = vsel %vm317_vm1, %v335_v59, %v331_v60 }
  0xb0   : > { %v349_v14 = vsel %vm348_vm3, %v336_v6, %v347_v11 }
  0xb1   : > { %v344_v9 = vrot.slane %v288_v4, %v315_v45  ;;  %v340_v10 = vrot.slane %v287_v5, %v310_v48  ;;  %v753_v45 = vmov 1985246804  }
  0xb2   : > { %v559_v46 = vunpack.c.l.s4 %v753_v45 }
  0xb3   : > { %v345_v12 = vsel %vm317_vm1, %v344_v9, %v340_v10 }
  0xb4   : > { %v351_v15 = vsel %vm350_vm4, %v345_v12, %v349_v14  ;;  %v560_v48 = vunpack.c.0.s8 %v559_v46 }
  0xb5   : > { %718 = vmatmul.mubr.msk.f32.vlgmr.msra.gmra.mrb[0].mxu0 %vm352_vm5, %v351_v15 }
  0xb6   : > { %v563_v50 = vsub.s32 %v560_v48, %v838_v42 }
 0x188   : > { %v421_v18 = vpop.f32.mrb[0].mxu0 }
 0x189   : > { %v422_v19 = vadd.f32 %v700_v17, %v421_v18  ;;  %v719_v20 = vpop.f32.mrb[1].mxu0 }
 0x18b   : > { %v425_v21 = vmax.f32 %v422_v19, 0.0 }
 0x18d   : > { %723 = vmatmul.mubr.msk.f32.vlgmr.msra.gmra.mrb[0].mxu1 %vm434_vm6, %v425_v21 }
 0x260   : > { %v504_v25 = vpop.f32.mrb[0].mxu1 }
 0x261   : > { %v505_v26 = vadd.f32 %v702_v24, %v504_v25  ;;  %v724_v27 = vpop.f32.mrb[1].mxu1 }
 0x263   : > { %v508_v28 = vmul.f32 0.16666667, %v505_v26 }
 0x265   : > { %v509_v29 = vadd.f32 0.5, %v508_v28 }
 0x267   : > { %v510_v30 = vmax.f32 %v509_v29, 0.0 }
 0x269   : > { %v511_v31 = vmin.f32 %v510_v30, 1.0 }
 0x26b   : > { %v512_v32 = vpack.c.bf16 %v511_v31, %v511_v31 }
 0x26d   : > { %v514_v35 = vpack.i.b16 %v512_v32, %v512_v32  ;;  %v523_v36 = vshrl.u32 %v512_v32, 16 }
 0x26f   : > { %v536_v37 = vrot.slane %v514_v35, %v535_v33  ;;  %v519_v38 = vrot.slane %v514_v35, %v518_v34  ;;  %v524_v39 = vpack.i.b16 %v523_v36, %v523_v36 }
 0x271   : > { %538 = vbcast.lane.c.b16.xlu1 %v536_v37, 256  ;;  %521 = vbcast.lane.c.b16.xlu0 %v519_v38, 256  ;;  %v529_v40 = vrot.slane %v524_v39, %v518_v34  ;;  %v543_v41 = vrot.slane %v524_v39, %v535_v33 }
 0x275   : > { %531 = vbcast.lane.c.b16.xlu1 %v529_v40, 256 }
 0x279   : > { %545 = vbcast.lane.c.b16.xlu1 %v543_v41, 256 }
 0x2e3   : > { %v539_v51 = vpop.permute.xlu1 %538  ;;  %v522_v52 = vpop.permute.xlu0 %521 }
 0x2e4   : > { %v557_v53 = vrot.slane %v522_v52, %v556_v49  ;;  %v564_v54 = vrot.slane %v522_v52, %v563_v50  ;;  %v585_v57 = vrot.slane %v539_v51, %v556_v49  ;;  %v592_v58 = vrot.slane %v539_v51, %v563_v50 }
 0x2e6   : > { %v615_v55 = vmul.bf16 %v557_v53, %v802_v1  ;;  %v616_v56 = vmul.bf16 %v564_v54, %v810_v7  ;;  %v619_v63 = vmul.bf16 %v585_v57, %v818_v13  ;;  %v620_v3 = vmul.bf16 %v592_v58, %v812_v8 }
 0x2e7   : > { %v532_v59 = vpop.permute.xlu1 %531 }
 0x2e8   : > { %623 = vst [vmem:[%s231_s12] sm:$0xff] %v615_v55  ;;  %624 = vst [vmem:[%s231_s12 + $0x8] sm:$0xff] %v616_v56  ;;  %v571_v60 = vrot.slane %v532_v59, %v556_v49  ;;  %v578_v42 = vrot.slane %v532_v59, %v563_v50 }
 0x2e9   : > { %627 = vst [vmem:[%s231_s12 + $0x20] sm:$0xff] %v619_v63  ;;  %628 = vst [vmem:[%s231_s12 + $0x28] sm:$0xff] %v620_v3 }
 0x2ea   : > { %v617_v61 = vmul.bf16 %v571_v60, %v800_v0  ;;  %v618_v62 = vmul.bf16 %v578_v42, %v804_v2 }
 0x2eb   : > { %v546_v4 = vpop.permute.xlu1 %545 }
 0x2ec   : > { %625 = vst [vmem:[%s231_s12 + $0x10] sm:$0xff] %v617_v61  ;;  %626 = vst [vmem:[%s231_s12 + $0x18] sm:$0xff] %v618_v62  ;;  %v599_v1 = vrot.slane %v546_v4, %v556_v49  ;;  %v606_v7 = vrot.slane %v546_v4, %v563_v50 }
 0x2ee   : > { %v621_v5 = vmul.bf16 %v599_v1, %v826_v23  ;;  %v622_v6 = vmul.bf16 %v606_v7, %v824_v22 }
 0x2f0   : > { %629 = vst [vmem:[%s231_s12 + $0x30] sm:$0xff] %v621_v5  ;;  %630 = vst [vmem:[%s231_s12 + $0x38] sm:$0xff] %v622_v6 }
 0x2f1 PF: > { %s15_s18 = sadd.s32 1, %s747_s18  }
 0x2f2   : > { %p12_p4 = scmp.ge.s32.totalorder %s15_s18, 4  }
 0x2f4   :  { %14 = sbr.rel (!%p12_p4) target bundleno = 1 (0x1), region = 70 }

</bundles_post_ra>
